<compile_context>
chip_gen: v7x
topology: tpu7x:2x2x1
jax: 0.10.0
libtpu: 0.0.40
codegen_flags: <defaults>
</compile_context>

<pallas_src>
import functools

import jax
import jax.numpy as jnp
import numpy as np
from jax import lax
from jax.experimental import pallas as pl
from jax.experimental.pallas import tpu as pltpu


def _nms_kernel(thr_ref, rel_ref, rep_ref, top_ref, bot_ref, out_ref, *,
                compute_dtype, tb, halo, w):
    cdt = compute_dtype
    rel_thr = thr_ref[0].astype(cdt)
    rep_thr = thr_ref[1].astype(cdt)

    r = pl.program_id(1)                       # row-tile index
    is_first_tile = r == 0
    is_last_tile = r == pl.num_programs(1) - 1

    # Border masks, hoisted (broadcasts are not CSEd by JAX).
    col = lax.broadcasted_iota(jnp.int32, (tb, w), 1)
    row = lax.broadcasted_iota(jnp.int32, (tb, w), 0)
    first_col = col == 0
    last_col = col == (w - 1)
    first_row = row == 0
    last_row = row == (tb - 1)
    hcol = lax.broadcasted_iota(jnp.int32, (1, w), 1)
    h_first_col = hcol == 0
    h_last_col = hcol == (w - 1)

    def hmax(x, fc, lc):
        # max(rep_thr, x[.., c-1], x[.., c], x[.., c+1]); lanes rotated in from
        # outside the image are replaced with rep_thr (the running-max floor).
        lane_ax = x.ndim - 1
        left = jnp.where(fc, rep_thr, pltpu.roll(x, shift=1, axis=lane_ax))
        right = jnp.where(lc, rep_thr, pltpu.roll(x, shift=w - 1, axis=lane_ax))
        return jnp.maximum(jnp.maximum(x, rep_thr), jnp.maximum(left, right))

    rep = rep_ref[...].astype(cdt)                        # (pb, tb, w)
    rel = rel_ref[...].astype(cdt)                        # (pb, tb, w)
    top = top_ref[:, halo - 1:halo, :].astype(cdt)        # (pb, 1, w)
    bot = bot_ref[:, 0:1, :].astype(cdt)                  # (pb, 1, w)

    h = hmax(rep, first_col, last_col)                    # (pb, tb, w)
    ht = jnp.where(is_first_tile, rep_thr,
                   hmax(top, h_first_col, h_last_col))    # (pb, 1, w)
    hb = jnp.where(is_last_tile, rep_thr,
                   hmax(bot, h_first_col, h_last_col))    # (pb, 1, w)

    # TODO(synk): the two full-block row-border selects below could be replaced
    # by (1, w) fixups of rows 0 / tb-1 only (saves ~10% VALU work).
    up = jnp.where(first_row, ht, pltpu.roll(h, shift=1, axis=1))
    down = jnp.where(last_row, hb, pltpu.roll(h, shift=tb - 1, axis=1))
    m = jnp.maximum(h, jnp.maximum(up, down))   # = max(rep_thr, 3x3 max)

    maxima = (rep == m) & (rel >= rel_thr)
    out_ref[...] = maxima.astype(jnp.int8)


def _default_compute_dtype(in_dtype):
    if np.dtype(in_dtype) != np.dtype(jnp.bfloat16):
        return jnp.float32
    try:  # v5e has no bf16 VALU; keep f32 there, bf16-native on v6e/v7x.
        kind = jax.devices()[0].device_kind.lower()
    except Exception:
        kind = ""
    if "v5 lite" in kind or "v5e" in kind or "v5lite" in kind:
        return jnp.float32
    return jnp.bfloat16


def _choose_row_tile(hp, wp, per_px_bytes, budget):
    # Largest row tile (multiple of 32) whose per-plane footprint fits budget.
    max_rows = max(32, (budget // (wp * per_px_bytes)) // 32 * 32)
    if hp <= max_rows:
        return hp
    best = 32
    t = 32
    while t <= max_rows:
        if hp % t == 0:
            best = t
        t += 32
    return best


def _choose_plane_block(nc, tb, wp, per_px_bytes, budget):
    per_plane = tb * wp * per_px_bytes
    return max(1, min(nc, budget // max(per_plane, 1)))


def nms_maxima_mask(reliability, repeatability, rel_thr=0.7, rep_thr=0.7,
                    compute_dtype=None, row_tile=None):
    """Returns the int8 maxima mask with the same NCHW shape as the inputs."""
    assert reliability.shape == repeatability.shape
    if (reliability.dtype != repeatability.dtype
            or repeatability.dtype not in (jnp.float32, jnp.bfloat16)):
        reliability = reliability.astype(jnp.float32)
        repeatability = repeatability.astype(jnp.float32)
    in_dtype = repeatability.dtype
    if compute_dtype is None:
        compute_dtype = _default_compute_dtype(in_dtype)

    n, c, h0, w0 = repeatability.shape
    nc = n * c
    rel = reliability.reshape(nc, h0, w0)
    rep = repeatability.reshape(nc, h0, w0)

    # Pad spatial dims so the int8 output is lane/sublane-dense and any H tiles
    # cleanly; -inf padding never creates maxima and matches the reference's
    # -inf border for the real boundary pixels.
    hp = -(-h0 // 32) * 32
    wp = -(-w0 // 128) * 128

    in_bytes = np.dtype(in_dtype).itemsize
    c_bytes = np.dtype(compute_dtype).itemsize
    # double-buffered rel+rep inputs + int8 output + ~6 live compute temps
    per_px = 4 * in_bytes + 2 + 6 * c_bytes
    budget = 12 * 1024 * 1024

    pack = 32 // in_bytes              # sublane packing of the input dtype
    halo = pack                        # halo block = one packed sublane group

    if row_tile is not None:
        assert hp % row_tile == 0 and row_tile % 32 == 0
        tb = row_tile
    else:
        tb = _choose_row_tile(hp, wp, per_px, budget)

    pb = _choose_plane_block(nc, tb, wp, per_px, budget)
    n_plane = -(-nc // pb)

    # Megacore (v7x): avoid a degenerate (1, 1) grid by splitting rows.
    if row_tile is None and n_plane == 1 and tb == hp and hp > 32:
        for t in range((hp // 64) * 32, 31, -32):
            if hp % t == 0:
                tb = t
                break

    n_row = hp // tb
    bpt = tb // halo                   # halo blocks per row tile
    last_halo = hp // halo - 1

    nc_pad = n_plane * pb
    pad_p, pad_h, pad_w = nc_pad - nc, hp - h0, wp - w0
    if pad_p or pad_h or pad_w:
        cfg = ((0, pad_p), (0, pad_h), (0, pad_w))
        rel = jnp.pad(rel, cfg, constant_values=float("-inf"))
        rep = jnp.pad(rep, cfg, constant_values=float("-inf"))

    thr = jnp.array([rel_thr, rep_thr], dtype=jnp.float32)

    kernel = functools.partial(_nms_kernel, compute_dtype=compute_dtype,
                               tb=tb, halo=halo, w=wp)

    main_map = lambda p, r: (p, r, 0)
    top_map = lambda p, r: (p, jnp.maximum(r * bpt - 1, 0), 0)
    bot_map = lambda p, r: (p, jnp.minimum((r + 1) * bpt, last_halo), 0)

    mask = pl.pallas_call(
        kernel,
        out_shape=jax.ShapeDtypeStruct((nc_pad, hp, wp), jnp.int8),
        grid=(n_plane, n_row),
        in_specs=[
            pl.BlockSpec(memory_space=pltpu.MemorySpace.SMEM),  # thresholds
            pl.BlockSpec((pb, tb, wp), main_map),     # reliability
            pl.BlockSpec((pb, tb, wp), main_map),     # repeatability
            pl.BlockSpec((pb, halo, wp), top_map),    # rep rows above tile
            pl.BlockSpec((pb, halo, wp), bot_map),    # rep rows below tile
        ],
        out_specs=pl.BlockSpec((pb, tb, wp), main_map),
        compiler_params=pltpu.CompilerParams(
            dimension_semantics=("parallel", "parallel"),
            vmem_limit_bytes=32 * 1024 * 1024),
    )(thr, rel, rep, rep, rep)

    mask = mask[:nc, :h0, :w0].reshape(n, c, h0, w0)
    return mask


def non_max_suppression(reliability, repeatability, rel_thr=0.7, rep_thr=0.7,
                        compute_dtype=None, row_tile=None, max_keypoints=None):
    mask = nms_maxima_mask(reliability, repeatability, rel_thr, rep_thr,
                           compute_dtype=compute_dtype, row_tile=row_tile)
    if max_keypoints is not None:
        # jit/device-friendly fixed-size variant (padded with -1 rows).
        _, _, y_idx, x_idx = jnp.nonzero(mask > 0, size=max_keypoints,
                                         fill_value=-1)
    else:
        # TODO(synk): exact `nonzero().t()[2:4]` has a data-dependent output
        # size, so it runs on the concrete mask outside the Pallas kernel.
        _, _, y_idx, x_idx = jnp.nonzero(mask > 0)
    return jnp.stack([y_idx, x_idx], axis=0), mask


def _reference_mask(rel, rep, rel_thr, rep_thr):
    # Pure NumPy reference for the maxima mask (MaxPool2d(3,1,1) + thresholds).
    rel = np.asarray(rel, np.float32)
    rep = np.asarray(rep, np.float32)
    n, c, h, w = rep.shape
    rep_p = np.full((n, c, h + 2, w + 2), -np.inf, np.float32)
    rep_p[:, :, 1:h + 1, 1:w + 1] = rep
    mx = np.full((n, c, h, w), -np.inf, np.float32)
    for dy in range(3):
        for dx in range(3):
            mx = np.maximum(mx, rep_p[:, :, dy:dy + h, dx:dx + w])
    return (rep == mx) & (rep >= np.float32(rep_thr)) & (rel >= np.float32(rel_thr))


if __name__ == "__main__":
    key = jax.random.PRNGKey(0)

    def check(k, shape, dtype, compute_dtype, row_tile=None,
              rel_thr=0.7, rep_thr=0.7):
        k_rel, k_rep = jax.random.split(k)
        rel = jax.random.uniform(k_rel, shape, dtype=jnp.float32).astype(dtype)
        rep = jax.random.uniform(k_rep, shape, dtype=jnp.float32).astype(dtype)
        coords, mask = non_max_suppression(rel, rep, rel_thr, rep_thr,
                                           compute_dtype=compute_dtype,
                                           row_tile=row_tile)
        jax.block_until_ready(mask)
        jax.block_until_ready(coords)
        # Thresholds exactly as the kernel sees them (f32 SMEM -> compute dtype).
        rel_t = float(jnp.asarray(rel_thr, jnp.float32).astype(compute_dtype))
        rep_t = float(jnp.asarray(rep_thr, jnp.float32).astype(compute_dtype))
        ref = _reference_mask(np.asarray(rel.astype(jnp.float32)),
                              np.asarray(rep.astype(jnp.float32)),
                              rel_t, rep_t)
        got = np.asarray(mask) > 0
        assert got.shape == shape
        np.testing.assert_array_equal(got, ref)
        assert coords.shape[0] == 2
        assert coords.shape[1] == int(ref.sum())

    k1, k2, k3, k4 = jax.random.split(key, 4)
    # Small f32 case matching the original demo (H/W padded to 32/128).
    check(k1, (2, 1, 16, 16), jnp.float32, compute_dtype=jnp.float32)
    # bf16-native compute path; row split exercises the halo blocks.
    check(k2, (1, 2, 64, 128), jnp.bfloat16, compute_dtype=jnp.bfloat16)
    # bf16 inputs with f32 compute (v5e-style path) + explicit 32-row tiling.
    check(k3, (1, 2, 96, 128), jnp.bfloat16, compute_dtype=jnp.float32,
          row_tile=32)
    # Odd plane count and non-128-multiple width (plane/W padding paths).
    check(k4, (1, 3, 32, 96), jnp.float32, compute_dtype=jnp.float32)

    print("KERNEL_OK")
</pallas_src>

<mosaic_0001>
module attributes {stable_mosaic.version = 11 : i64} {
  func.func @_nms_kernel(%arg0: i32, %arg1: i32, %arg2: memref<2xf32, #tpu.memory_space<smem>>, %arg3: memref<2x32x128xf32, #tpu.memory_space<vmem>>, %arg4: memref<2x32x128xf32, #tpu.memory_space<vmem>>, %arg5: memref<2x8x128xf32, #tpu.memory_space<vmem>>, %arg6: memref<2x8x128xf32, #tpu.memory_space<vmem>>, %arg7: memref<2x32x128xi8, #tpu.memory_space<vmem>>) attributes {dimension_semantics = [#tpu.dimension_semantics<parallel>, #tpu.dimension_semantics<parallel>], iteration_bounds = array<i64: 1, 1>, scalar_prefetch = 0 : i64, scratch_operands = 0 : i64, tpu.core_type = #tpu.core_type<tc>, window_params = [{transform_indices = @transform_0, window_bounds = array<i64: 2>}, {transform_indices = @transform_1, window_bounds = array<i64: 2, 32, 128>}, {transform_indices = @transform_2, window_bounds = array<i64: 2, 32, 128>}, {transform_indices = @transform_3, window_bounds = array<i64: 2, 8, 128>}, {transform_indices = @transform_4, window_bounds = array<i64: 2, 8, 128>}, {transform_indices = @transform_5, window_bounds = array<i64: 2, 32, 128>}]} {
    %c0 = arith.constant 0 : index
    %0 = memref.load %arg2[%c0] : memref<2xf32, #tpu.memory_space<smem>>
    %c1 = arith.constant 1 : index
    %1 = memref.load %arg2[%c1] : memref<2xf32, #tpu.memory_space<smem>>
    %c0_i32 = arith.constant 0 : i32
    %2 = arith.cmpi eq, %arg1, %c0_i32 : i32
    %c0_i32_0 = arith.constant 0 : i32
    %3 = arith.cmpi eq, %arg1, %c0_i32_0 : i32
    %4 = tpu.iota {dimensions = array<i32: 1>} : vector<32x128xi32>
    %5 = tpu.iota {dimensions = array<i32: 0>} : vector<32x128xi32>
    %c0_i32_1 = arith.constant 0 : i32
    %6 = vector.broadcast %c0_i32_1 : i32 to vector<32x128xi32>
    %7 = arith.cmpi eq, %4, %6 : vector<32x128xi32>
    %c127_i32 = arith.constant 127 : i32
    %8 = vector.broadcast %c127_i32 : i32 to vector<32x128xi32>
    %9 = arith.cmpi eq, %4, %8 : vector<32x128xi32>
    %c0_i32_2 = arith.constant 0 : i32
    %10 = vector.broadcast %c0_i32_2 : i32 to vector<32x128xi32>
    %11 = arith.cmpi eq, %5, %10 : vector<32x128xi32>
    %c31_i32 = arith.constant 31 : i32
    %12 = vector.broadcast %c31_i32 : i32 to vector<32x128xi32>
    %13 = arith.cmpi eq, %5, %12 : vector<32x128xi32>
    %14 = tpu.iota {dimensions = array<i32: 1>} : vector<1x128xi32>
    %c0_i32_3 = arith.constant 0 : i32
    %15 = vector.broadcast %c0_i32_3 : i32 to vector<1x128xi32>
    %16 = arith.cmpi eq, %14, %15 : vector<1x128xi32>
    %c127_i32_4 = arith.constant 127 : i32
    %17 = vector.broadcast %c127_i32_4 : i32 to vector<1x128xi32>
    %18 = arith.cmpi eq, %14, %17 : vector<1x128xi32>
    %c0_5 = arith.constant 0 : index
    %c0_6 = arith.constant 0 : index
    %c0_7 = arith.constant 0 : index
    %19 = vector.load %arg4[%c0_5, %c0_6, %c0_7] : memref<2x32x128xf32, #tpu.memory_space<vmem>>, vector<2x32x128xf32>
    %c0_8 = arith.constant 0 : index
    %c0_9 = arith.constant 0 : index
    %c0_10 = arith.constant 0 : index
    %20 = vector.load %arg3[%c0_8, %c0_9, %c0_10] : memref<2x32x128xf32, #tpu.memory_space<vmem>>, vector<2x32x128xf32>
    %c0_11 = arith.constant 0 : index
    %c7 = arith.constant 7 : index
    %c0_12 = arith.constant 0 : index
    %21 = vector.load %arg5[%c0_11, %c7, %c0_12] : memref<2x8x128xf32, #tpu.memory_space<vmem>>, vector<2x1x128xf32>
    %c0_13 = arith.constant 0 : index
    %c0_14 = arith.constant 0 : index
    %c0_15 = arith.constant 0 : index
    %22 = vector.load %arg6[%c0_13, %c0_14, %c0_15] : memref<2x8x128xf32, #tpu.memory_space<vmem>>, vector<2x1x128xf32>
    %c1_i32 = arith.constant 1 : i32
    %23 = tpu.dynamic_rotate %19 by %c1_i32 dim 2 : vector<2x32x128xf32>, i32 -> vector<2x32x128xf32>
    %24 = vector.shape_cast %7 : vector<32x128xi1> to vector<1x32x128xi1>
    %25 = vector.broadcast %24 : vector<1x32x128xi1> to vector<2x32x128xi1>
    %26 = vector.broadcast %1 : f32 to vector<2x32x128xf32>
    %27 = arith.select %25, %26, %23 : vector<2x32x128xi1>, vector<2x32x128xf32>
    %c127_i32_16 = arith.constant 127 : i32
    %28 = tpu.dynamic_rotate %19 by %c127_i32_16 dim 2 : vector<2x32x128xf32>, i32 -> vector<2x32x128xf32>
    %29 = vector.shape_cast %9 : vector<32x128xi1> to vector<1x32x128xi1>
    %30 = vector.broadcast %29 : vector<1x32x128xi1> to vector<2x32x128xi1>
    %31 = vector.broadcast %1 : f32 to vector<2x32x128xf32>
    %32 = arith.select %30, %31, %28 : vector<2x32x128xi1>, vector<2x32x128xf32>
    %33 = vector.broadcast %1 : f32 to vector<2x32x128xf32>
    %34 = arith.maximumf %19, %33 : vector<2x32x128xf32>
    %35 = arith.maximumf %27, %32 : vector<2x32x128xf32>
    %36 = arith.maximumf %34, %35 : vector<2x32x128xf32>
    %c1_i32_17 = arith.constant 1 : i32
    %37 = tpu.dynamic_rotate %21 by %c1_i32_17 dim 2 : vector<2x1x128xf32>, i32 -> vector<2x1x128xf32>
    %38 = vector.shape_cast %16 : vector<1x128xi1> to vector<1x1x128xi1>
    %39 = vector.broadcast %38 : vector<1x1x128xi1> to vector<2x1x128xi1>
    %40 = vector.broadcast %1 : f32 to vector<2x1x128xf32>
    %41 = arith.select %39, %40, %37 : vector<2x1x128xi1>, vector<2x1x128xf32>
    %c127_i32_18 = arith.constant 127 : i32
    %42 = tpu.dynamic_rotate %21 by %c127_i32_18 dim 2 : vector<2x1x128xf32>, i32 -> vector<2x1x128xf32>
    %43 = vector.shape_cast %18 : vector<1x128xi1> to vector<1x1x128xi1>
    %44 = vector.broadcast %43 : vector<1x1x128xi1> to vector<2x1x128xi1>
    %45 = vector.broadcast %1 : f32 to vector<2x1x128xf32>
    %46 = arith.select %44, %45, %42 : vector<2x1x128xi1>, vector<2x1x128xf32>
    %47 = vector.broadcast %1 : f32 to vector<2x1x128xf32>
    %48 = arith.maximumf %21, %47 : vector<2x1x128xf32>
    %49 = arith.maximumf %41, %46 : vector<2x1x128xf32>
    %50 = arith.maximumf %48, %49 : vector<2x1x128xf32>
    %51 = vector.broadcast %1 : f32 to vector<2x1x128xf32>
    %52 = arith.select %2, %51, %50 : vector<2x1x128xf32>
    %c1_i32_19 = arith.constant 1 : i32
    %53 = tpu.dynamic_rotate %22 by %c1_i32_19 dim 2 : vector<2x1x128xf32>, i32 -> vector<2x1x128xf32>
    %54 = vector.shape_cast %16 : vector<1x128xi1> to vector<1x1x128xi1>
    %55 = vector.broadcast %54 : vector<1x1x128xi1> to vector<2x1x128xi1>
    %56 = vector.broadcast %1 : f32 to vector<2x1x128xf32>
    %57 = arith.select %55, %56, %53 : vector<2x1x128xi1>, vector<2x1x128xf32>
    %c127_i32_20 = arith.constant 127 : i32
    %58 = tpu.dynamic_rotate %22 by %c127_i32_20 dim 2 : vector<2x1x128xf32>, i32 -> vector<2x1x128xf32>
    %59 = vector.shape_cast %18 : vector<1x128xi1> to vector<1x1x128xi1>
    %60 = vector.broadcast %59 : vector<1x1x128xi1> to vector<2x1x128xi1>
    %61 = vector.broadcast %1 : f32 to vector<2x1x128xf32>
    %62 = arith.select %60, %61, %58 : vector<2x1x128xi1>, vector<2x1x128xf32>
    %63 = vector.broadcast %1 : f32 to vector<2x1x128xf32>
    %64 = arith.maximumf %22, %63 : vector<2x1x128xf32>
    %65 = arith.maximumf %57, %62 : vector<2x1x128xf32>
    %66 = arith.maximumf %64, %65 : vector<2x1x128xf32>
    %67 = vector.broadcast %1 : f32 to vector<2x1x128xf32>
    %68 = arith.select %3, %67, %66 : vector<2x1x128xf32>
    %c1_i32_21 = arith.constant 1 : i32
    %69 = tpu.dynamic_rotate %36 by %c1_i32_21 dim 1 : vector<2x32x128xf32>, i32 -> vector<2x32x128xf32>
    %70 = vector.shape_cast %11 : vector<32x128xi1> to vector<1x32x128xi1>
    %71 = vector.broadcast %70 : vector<1x32x128xi1> to vector<2x32x128xi1>
    %72 = vector.shape_cast %52 : vector<2x1x128xf32> to vector<2x1x128xf32>
    %73 = vector.broadcast %72 : vector<2x1x128xf32> to vector<2x32x128xf32>
    %74 = arith.select %71, %73, %69 : vector<2x32x128xi1>, vector<2x32x128xf32>
    %c31_i32_22 = arith.constant 31 : i32
    %75 = tpu.dynamic_rotate %36 by %c31_i32_22 dim 1 : vector<2x32x128xf32>, i32 -> vector<2x32x128xf32>
    %76 = vector.shape_cast %13 : vector<32x128xi1> to vector<1x32x128xi1>
    %77 = vector.broadcast %76 : vector<1x32x128xi1> to vector<2x32x128xi1>
    %78 = vector.shape_cast %68 : vector<2x1x128xf32> to vector<2x1x128xf32>
    %79 = vector.broadcast %78 : vector<2x1x128xf32> to vector<2x32x128xf32>
    %80 = arith.select %77, %79, %75 : vector<2x32x128xi1>, vector<2x32x128xf32>
    %81 = arith.maximumf %74, %80 : vector<2x32x128xf32>
    %82 = arith.maximumf %36, %81 : vector<2x32x128xf32>
    %83 = arith.cmpf oeq, %19, %82 : vector<2x32x128xf32>
    %84 = vector.broadcast %0 : f32 to vector<2x32x128xf32>
    %85 = arith.cmpf oge, %20, %84 : vector<2x32x128xf32>
    %86 = arith.andi %83, %85 : vector<2x32x128xi1>
    %87 = arith.extui %86 : vector<2x32x128xi1> to vector<2x32x128xi8>
    %c0_23 = arith.constant 0 : index
    %c0_24 = arith.constant 0 : index
    %c0_25 = arith.constant 0 : index
    %88 = vector.load %arg7[%c0_23, %c0_24, %c0_25] : memref<2x32x128xi8, #tpu.memory_space<vmem>>, vector<2x32x128xi8>
    tpu.vector_store %arg7[%c0_23, %c0_24, %c0_25], %87 {strides = array<i32>} : memref<2x32x128xi8, #tpu.memory_space<vmem>>, vector<2x32x128xi8>,
    return
  }
  func.func @transform_0(%arg0: i32, %arg1: i32) -> i32 {
    %c0_i32 = arith.constant 0 : i32
    %c0_i32_0 = arith.constant 0 : i32
    return %c0_i32 : i32
  }
  func.func @transform_1(%arg0: i32, %arg1: i32) -> (i32, i32, i32) {
    %c0_i32 = arith.constant 0 : i32
    %c0_i32_0 = arith.constant 0 : i32
    return %arg0, %arg1, %c0_i32 : i32, i32, i32
  }
  func.func @transform_2(%arg0: i32, %arg1: i32) -> (i32, i32, i32) {
    %c0_i32 = arith.constant 0 : i32
    %c0_i32_0 = arith.constant 0 : i32
    return %arg0, %arg1, %c0_i32 : i32, i32, i32
  }
  func.func @transform_3(%arg0: i32, %arg1: i32) -> (i32, i32, i32) {
    %c4_i32 = arith.constant 4 : i32
    %0 = arith.muli %arg1, %c4_i32 : i32
    %c1_i32 = arith.constant 1 : i32
    %1 = arith.subi %0, %c1_i32 : i32
    %c0_i32 = arith.constant 0 : i32
    %2 = arith.maxsi %1, %c0_i32 : i32
    %c0_i32_0 = arith.constant 0 : i32
    %c0_i32_1 = arith.constant 0 : i32
    return %arg0, %2, %c0_i32_0 : i32, i32, i32
  }
  func.func @transform_4(%arg0: i32, %arg1: i32) -> (i32, i32, i32) {
    %c1_i32 = arith.constant 1 : i32
    %0 = arith.addi %arg1, %c1_i32 : i32
    %c4_i32 = arith.constant 4 : i32
    %1 = arith.muli %0, %c4_i32 : i32
    %c3_i32 = arith.constant 3 : i32
    %2 = arith.minsi %1, %c3_i32 : i32
    %c0_i32 = arith.constant 0 : i32
    %c0_i32_0 = arith.constant 0 : i32
    return %arg0, %2, %c0_i32 : i32, i32, i32
  }
  func.func @transform_5(%arg0: i32, %arg1: i32) -> (i32, i32, i32) {
    %c0_i32 = arith.constant 0 : i32
    %c0_i32_0 = arith.constant 0 : i32
    return %arg0, %arg1, %c0_i32 : i32, i32, i32
  }
}

</mosaic_0001>

<bundles_post_ra>
// kernel: tpu_custom_call.1
= control target key start
LH: loop header
LB: loop body
LE: loop exit
PB: predicated region body
PF: predicated region fallthrough
CT: control target
= control target key end

     0   :  { %10 = vsyncpa [#allocation5], 0  ;;  %s959_s0 = inlined_call_operand.hbm [shape: f32[2], index: 0, kind: input, shape index: {}]   ;;  %s960_s1 = inlined_call_operand.hbm [shape: f32[2,32,128], index: 1, kind: input, shape index: {}]   ;;  %s961_s2 = inlined_call_operand.hbm [shape: f32[2,32,128], index: 2, kind: input, shape index: {}]   ;;  %s962_s3 = inlined_call_operand.hbm [shape: f32[2,32,128], index: 3, kind: input, shape index: {}]   ;;  %s963_s4 = inlined_call_operand.hbm [shape: f32[2,32,128], index: 4, kind: input, shape index: {}]   ;;  %s964_s5 = inlined_call_operand.hbm [shape: s8[2,32,128], index: 5, kind: output, shape index: {}]  }
   0x1   :  { %11 = vsyncpa [#allocation3], 0 }
   0x2   :  { %12 = vsyncpa [#allocation8], 0 }
   0x3   :  { %13 = vsyncpa [#allocation11], 0 }
   0x4   :  { %14 = vsyncpa [#allocation4], 0  ;;  %s572_s18 = smov [#allocation7]   ;;  %s573_s20 = smov [#allocation6]  }
   0x5   :  { %s40_s19 = sshll.u32 %s572_s18, 4  ;;  %s28_s21 = sshll.u32 %s573_s20, 4  ;;  %s41_s19 = int_to_ptr.vmem [resolvable:$true] %s40_s19  ;;  %s29_s21 = int_to_ptr.vmem [resolvable:$true] %s28_s21 }
   0x6   :  { %s439_s24 = scalar_lea.hbm %s961_s2, 1024 }
   0x7   :  { %p440_p0 = scmp.ne.s32.totalorder %s961_s2, %s439_s24  ;;  %p443_p1 = scmp.lt.u32.totalorder %s439_s24, %s961_s2 }
   0x9   :  { %p445_p2 = pnand %p443_p1, %p440_p0 }
   0xb   :  { %448 = shalt.err (!%p445_p2)
}
   0xc   :  { %s449_s29 = scalar_lea.vmem %s41_s19, 1024  ;;  %p454_p4 = scmp.lt.s32.totalorder %s41_s19, %s41_s19 }
   0xd   :  { %p450_p3 = scmp.ne.s32.totalorder %s41_s19, %s449_s29  ;;  %p455_p5 = scmp.lt.s32.totalorder %s449_s29, %s449_s29 }
   0xf   :  { %p456_p6 = por %p455_p5, %p454_p4 }
  0x11   :  { %p457_p7 = pnand %p456_p6, %p450_p3 }
  0x13   :  { %460 = shalt.err (!%p457_p7)
}
  0x14   :  { %s574_s30 = smov 128   ;;  %s575_s6 = smov 8  }
  0x15   :  { %46 = dma.hbm_to_vmem [thread:$0]  %s961_s2, 1024, %s41_s19, [#allocation8], %s574_s30, %s574_s30, %s575_s6  }
  0x16   :  { %s461_s11 = scalar_lea.hbm %s959_s0, 16 }
  0x17   :  { %p462_p8 = scmp.ne.s32.totalorder %s959_s0, %s461_s11  ;;  %p465_p9 = scmp.lt.u32.totalorder %s461_s11, %s959_s0 }
  0x19   :  { %p467_p10 = pnand %p465_p9, %p462_p8 }
  0x1b   :  { %470 = shalt.err (!%p467_p10)
}
  0x1c   :  { %s576_s16 = smov [#allocation2]   ;;  %s471_s20 = scalar_lea.hbm %s960_s1, 1024 }
  0x1d   :  { %22 = dma.hbm_to_smem %s959_s0, 16, %s576_s16, [#allocation5]  }
  0x1e   :  { %p472_p11 = scmp.ne.s32.totalorder %s960_s1, %s471_s20  ;;  %p475_p12 = scmp.lt.u32.totalorder %s471_s20, %s960_s1 }
  0x20   :  { %p477_p13 = pnand %p475_p12, %p472_p11 }
  0x22   :  { %480 = shalt.err (!%p477_p13)
}
  0x23   :  { %s481_s26 = scalar_lea.vmem %s29_s21, 1024  ;;  %p486_p1 = scmp.lt.s32.totalorder %s29_s21, %s29_s21 }
  0x24   :  { %p482_p0 = scmp.ne.s32.totalorder %s29_s21, %s481_s26  ;;  %p487_p2 = scmp.lt.s32.totalorder %s481_s26, %s481_s26 }
  0x26   :  { %p488_p3 = por %p487_p2, %p486_p1 }
  0x28   :  { %p489_p4 = pnand %p488_p3, %p482_p0 }
  0x2a   :  { %492 = shalt.err (!%p489_p4)
}
  0x2b   :  { %34 = dma.hbm_to_vmem [thread:$0]  %s960_s1, 1024, %s29_s21, [#allocation3], %s574_s30, %s574_s30, %s575_s6  }
  0x2c   :  { %s577_s28 = smov [#allocation9]   ;;  %s493_s9 = scalar_lea.hbm %s962_s3, 256 }
  0x2d   :  { %s58_s29 = sshll.u32 %s577_s28, 4  ;;  %p494_p5 = scmp.ne.s32.totalorder %s962_s3, %s493_s9  ;;  %s59_s29 = int_to_ptr.vmem [resolvable:$true] %s58_s29 }
  0x2e   :  { %s495_s14 = scalar_lea.hbm %s962_s3, 1024  ;;  %p497_p7 = scmp.lt.u32.totalorder %s493_s9, %s962_s3 }
  0x2f   :  { %p496_p6 = scmp.lt.u32.totalorder %s495_s14, %s493_s9 }
  0x31   :  { %p498_p8 = por %p497_p7, %p496_p6 }
  0x33   :  { %p499_p9 = pnand %p498_p8, %p494_p5 }
  0x35   :  { %502 = shalt.err (!%p499_p9)
}
  0x36   :  { %s503_s1 = scalar_lea.vmem %s59_s29, 256  ;;  %p508_p11 = scmp.lt.s32.totalorder %s59_s29, %s59_s29 }
  0x37   :  { %p504_p10 = scmp.ne.s32.totalorder %s59_s29, %s503_s1  ;;  %p509_p12 = scmp.lt.s32.totalorder %s503_s1, %s503_s1 }
  0x39   :  { %p510_p13 = por %p509_p12, %p508_p11 }
  0x3b   :  { %p511_p0 = pnand %p510_p13, %p504_p10 }
  0x3d   :  { %514 = shalt.err (!%p511_p0)
}
  0x3e   :  { %s578_s21 = smov 512   ;;  %s75_s20 = scalar_lea.hbm %s963_s4, 384 }
  0x3f   :  { %64 = dma.hbm_to_vmem [thread:$0]  %s962_s3, 256, %s59_s29, [#allocation8], %s578_s21, %s574_s30, %s575_s6  }
  0x40   :  { %s579_s22 = smov [#allocation10]   ;;  %s539_s26 = scalar_lea.hbm %s963_s4, 640 }
  0x41   :  { %s76_s23 = sshll.u32 %s579_s22, 4  ;;  %p516_p1 = scmp.ne.s32.totalorder %s75_s20, %s539_s26  ;;  %s77_s23 = int_to_ptr.vmem [resolvable:$true] %s76_s23 }
  0x42   :  { %s517_s28 = scalar_lea.hbm %s963_s4, 1024  ;;  %p518_p2 = scmp.lt.u32.totalorder %s75_s20, %s963_s4 }
  0x43   :  { %p519_p3 = scmp.lt.u32.totalorder %s517_s28, %s539_s26  ;;  %p521_p5 = scmp.lt.u32.totalorder %s539_s26, %s75_s20 }
  0x45   :  { %p520_p4 = por %p519_p3, %p518_p2 }
  0x47   :  { %p522_p6 = por %p521_p5, %p520_p4 }
  0x49   :  { %p523_p7 = pnand %p522_p6, %p516_p1 }
  0x4b   :  { %526 = shalt.err (!%p523_p7)
}
  0x4c   :  { %s527_s3 = scalar_lea.vmem %s77_s23, 256  ;;  %p532_p9 = scmp.lt.s32.totalorder %s77_s23, %s77_s23 }
  0x4d   :  { %p528_p8 = scmp.ne.s32.totalorder %s77_s23, %s527_s3  ;;  %p533_p10 = scmp.lt.s32.totalorder %s527_s3, %s527_s3 }
  0x4f   :  { %p534_p11 = por %p533_p10, %p532_p9 }
  0x51   :  { %p535_p12 = pnand %p534_p11, %p528_p8 }
  0x53   :  { %538 = shalt.err (!%p535_p12)
}
  0x54   :  { %82 = dma.hbm_to_vmem [thread:$0]  %s75_s20, 256, %s77_s23, [#allocation11], %s578_s21, %s574_s30, %s575_s6  }
  0x55   :  { %562 = dma.done.wait [#allocation5], 16  }
  0x56   :  { %563 = vsyncadd [#allocation5], 4294967280 }
  0x57   :  { %564 = dma.done.wait [#allocation3], 1024  }
  0x58   :  { %565 = vsyncadd [#allocation3], 4294966272 }
  0x59   :  { %566 = dma.done.wait [#allocation8], 1280  }
  0x5a   :  { %567 = vsyncadd [#allocation8], 4294966016 }
  0x5b   :  { %568 = dma.done.wait [#allocation11], 256  }
  0x5c   :  { %569 = vsyncadd [#allocation11], 4294967040 }
  0x5d   :  { %98 = sfence }
  0x5e   :  { %v687_v0 = vld [vmem:[#allocation7 + $0x20] sm:$0xff]  ;;  %s580_s4 = smov 1   ;;  %v693_v2 = vld [vmem:[#allocation7 + $0x38] sm:$0xff]  ;;  %s581_s29 = smov 127   ;;  %v703_v4 = vld [vmem:[#allocation7 + $0x10] sm:$0xff]  ;;  %v112_v8 = vlaneseq }
  0x5f   :  { %v689_v1 = vld [vmem:[#allocation7] sm:$0xff]  ;;  %157 = vrot.lane.b32.xlu1 %v687_v0, %s580_s4  ;;  %v695_v3 = vld [vmem:[#allocation7 + $0x18] sm:$0xff]  ;;  %v705_v5 = vld [vmem:[#allocation7 + $0x8] sm:$0xff]  ;;  %s426_s9 = sld [smem:[#allocation2 + $0x1]]  ;;  %s763_s10 = sld [smem:[#allocation2]] }
  0x60   :  { %149 = vrot.lane.b32.xlu0 %v689_v1, %s580_s4  ;;  %v709_v6 = vld [vmem:[#allocation7 + $0x30] sm:$0xff]  ;;  %v711_v7 = vld [vmem:[#allocation7 + $0x28] sm:$0xff]  ;;  %v719_v11 = vand.u32 127, %v112_v8  ;;  %v747_v29 = vshrl.u32 %v112_v8, 7  ;;  %s582_s11 = smov [#allocation12]  }
  0x61   :  { %s407_s12 = sshll.u32 %s582_s11, 4  ;;  %s408_s12 = int_to_ptr.vmem [resolvable:$true] %s407_s12 }
  0x62   :  { %vm120_vm0 = vcmp.eq.s32.totalorder %v719_v11, 127  ;;  %vm119_vm1 = vcmp.eq.s32.totalorder %v719_v11, 0  ;;  %v118_v40 = vadd.s32 24, %v747_v29  ;;  %v296_v41 = vsub.s32 0, %v747_v29  ;;  %s540_s13 = scalar_lea.vmem %s408_s12, 256  ;;  %p545_p0 = scmp.lt.s32.totalorder %s408_s12, %s408_s12 }
  0x63   :  { %163 = vrot.lane.b32.xlu1 %v693_v2, %s580_s4  ;;  %vm277_vm2 = vcmp.lt.s32.totalorder %v747_v29, 1  ;;  %vm318_vm3 = vcmp.lt.s32.totalorder %v747_v29, 7  ;;  %vm121_vm4 = vcmp.eq.s32.totalorder %v747_v29, 0  ;;  %p541_p13 = scmp.ne.s32.totalorder %s408_s12, %s540_s13  ;;  %p546_p1 = scmp.lt.s32.totalorder %s540_s13, %s540_s13 }
  0x64   :  { %155 = vrot.lane.b32.xlu0 %v695_v3, %s580_s4  ;;  %vm128_vm5 = vcmp.eq.s32.totalorder %v118_v40, 31 }
  0x65   :  { %v723_v14 = vstv %s426_s9  ;;  %p547_p2 = por %p546_p1, %p545_p0 }
  0x66   :  { %v205_v21 = vmax.f32 %v695_v3, %v723_v14  ;;  %v202_v23 = vmax.f32 %v689_v1, %v723_v14  ;;  %v209_v34 = vmax.f32 %v693_v2, %v723_v14  ;;  %v206_v36 = vmax.f32 %v687_v0, %v723_v14 }
  0x67   :  { %182 = vrot.lane.b32.xlu1 %v695_v3, %s581_s29  ;;  %v297_v50 = vrot.slane %v723_v14, %v296_v41  ;;  %v204_v51 = vmax.f32 %v703_v4, %v723_v14  ;;  %v203_v52 = vmax.f32 %v705_v5, %v723_v14  ;;  %p548_p3 = pnand %p547_p2, %p541_p13 }
  0x68   :  { %176 = vrot.lane.b32.xlu0 %v689_v1, %s581_s29 }
  0x6b   :  { %190 = vrot.lane.b32.xlu1 %v693_v2, %s581_s29 }
  0x6c   :  { %184 = vrot.lane.b32.xlu0 %v687_v0, %s581_s29 }
  0x6f   :  { %153 = vrot.lane.b32.xlu1 %v703_v4, %s580_s4 }
  0x70   :  { %151 = vrot.lane.b32.xlu0 %v705_v5, %s580_s4 }
  0x73   :  { %161 = vrot.lane.b32.xlu1 %v709_v6, %s580_s4 }
  0x74   :  { %159 = vrot.lane.b32.xlu0 %v711_v7, %s580_s4 }
  0x77   :  { %180 = vrot.lane.b32.xlu1 %v703_v4, %s581_s29 }
  0x78   :  { %178 = vrot.lane.b32.xlu0 %v705_v5, %s581_s29 }
  0x7b   :  { %188 = vrot.lane.b32.xlu1 %v709_v6, %s581_s29 }
  0x7c   :  { %186 = vrot.lane.b32.xlu0 %v711_v7, %s581_s29 }
  0xd1   :  { %v158_v9 = vpop.permute.xlu1 %157 }
  0xd2   :  { %v150_v10 = vpop.permute.xlu0 %149  ;;  %v172_v30 = vsel %vm119_vm1, %v723_v14, %v158_v9 }
  0xd3   :  { %v168_v19 = vsel %vm119_vm1, %v723_v14, %v150_v10 }
  0xd5   :  { %v164_v12 = vpop.permute.xlu1 %163 }
  0xd6   :  { %v156_v13 = vpop.permute.xlu0 %155  ;;  %v175_v31 = vsel %vm119_vm1, %v723_v14, %v164_v12  ;;  %v805_v12 = vld [vmem:[#allocation6] sm:$0xff] }
  0xd7   :  { %v171_v20 = vsel %vm119_vm1, %v723_v14, %v156_v13  ;;  %v808_v13 = vstv %s763_s10 }
  0xd8   :  { %vm376_vm6 = vcmp.ge.f32.partialorder %v805_v12, %v808_v13 }
  0xd9   :  { %v183_v15 = vpop.permute.xlu1 %182 }
  0xda   :  { %v177_v16 = vpop.permute.xlu0 %176  ;;  %v197_v17 = vsel %vm120_vm0, %v723_v14, %v183_v15  ;;  %v208_v15 = vmax.f32 %v709_v6, %v723_v14 }
  0xdb   :  { %v194_v18 = vsel %vm120_vm0, %v723_v14, %v177_v16  ;;  %v213_v22 = vmax.f32 %v171_v20, %v197_v17  ;;  %v207_v16 = vmax.f32 %v711_v7, %v723_v14  ;;  %v814_v17 = vld [vmem:[#allocation6 + $0x8] sm:$0xff] }
  0xdc   :  { %v210_v24 = vmax.f32 %v168_v19, %v194_v18  ;;  %vm377_vm7 = vcmp.ge.f32.partialorder %v814_v17, %v808_v13 }
  0xdd   :  { %v191_v25 = vpop.permute.xlu1 %190  ;;  %v755_v32 = vmax.f32 %v205_v21, %v213_v22 }
  0xde   :  { %v185_v26 = vpop.permute.xlu0 %184  ;;  %v201_v27 = vsel %vm120_vm0, %v723_v14, %v191_v25  ;;  %v757_v33 = vmax.f32 %v202_v23, %v210_v24  ;;  %v819_v24 = vld [vmem:[#allocation6 + $0x10] sm:$0xff] }
  0xdf   :  { %v198_v28 = vsel %vm120_vm0, %v723_v14, %v185_v26  ;;  %v217_v35 = vmax.f32 %v175_v31, %v201_v27  ;;  %v275_v42 = vrot.slane %v755_v32, 7  ;;  %v316_v43 = vrot.slane %v755_v32, 1 }
  0xe0   :  { %v214_v37 = vmax.f32 %v172_v30, %v198_v28  ;;  %v269_v44 = vrot.slane %v757_v33, 7  ;;  %v310_v45 = vrot.slane %v757_v33, 1  ;;  %vm378_vm8 = vcmp.ge.f32.partialorder %v819_v24, %v808_v13 }
  0xe1   :  { %v154_v38 = vpop.permute.xlu1 %153  ;;  %v771_v46 = vmax.f32 %v209_v34, %v217_v35  ;;  %v845_v34 = vld [vmem:[#allocation6 + $0x18] sm:$0xff] }
  0xe2   :  { %v152_v39 = vpop.permute.xlu0 %151  ;;  %v773_v47 = vmax.f32 %v206_v36, %v214_v37  ;;  %v284_v53 = vsel %vm277_vm2, %v275_v42, %v269_v44  ;;  %v325_v54 = vsel %vm318_vm3, %v316_v43, %v310_v45  ;;  %v170_v61 = vsel %vm119_vm1, %v723_v14, %v154_v38 }
  0xe3   :  { %v276_v55 = vrot.slane %v771_v46, 7  ;;  %v317_v56 = vrot.slane %v771_v46, 1  ;;  %v169_v62 = vsel %vm119_vm1, %v723_v14, %v152_v39  ;;  %v302_v18 = vsel %vm121_vm4, %v297_v50, %v284_v53 }
  0xe4   :  { %v270_v57 = vrot.slane %v773_v47, 7  ;;  %v311_v58 = vrot.slane %v773_v47, 1  ;;  %v346_v19 = vsel %vm128_vm5, %v297_v50, %v325_v54  ;;  %vm379_vm9 = vcmp.ge.f32.partialorder %v845_v34, %v808_v13 }
  0xe5   :  { %v162_v48 = vpop.permute.xlu1 %161 }
  0xe6   :  { %v160_v49 = vpop.permute.xlu0 %159  ;;  %v285_v25 = vsel %vm277_vm2, %v276_v55, %v270_v57  ;;  %v326_v26 = vsel %vm318_vm3, %v317_v56, %v311_v58  ;;  %v174_v27 = vsel %vm119_vm1, %v723_v14, %v162_v48 }
  0xe7   :  { %v173_v28 = vsel %vm119_vm1, %v723_v14, %v160_v49  ;;  %v306_v48 = vsel %vm121_vm4, %v297_v50, %v285_v25  ;;  %v350_v11 = vsel %vm128_vm5, %v297_v50, %v326_v26 }
  0xe9   :  { %v181_v59 = vpop.permute.xlu1 %180 }
  0xea   :  { %v179_v60 = vpop.permute.xlu0 %178  ;;  %v196_v63 = vsel %vm120_vm0, %v723_v14, %v181_v59 }
  0xeb   :  { %v195_v8 = vsel %vm120_vm0, %v723_v14, %v179_v60  ;;  %v212_v9 = vmax.f32 %v170_v61, %v196_v63 }
  0xec   :  { %v211_v10 = vmax.f32 %v169_v62, %v195_v8 }
  0xed   :  { %v220_v20 = vmax.f32 %v204_v51, %v212_v9  ;;  %v189_v22 = vpop.permute.xlu1 %188 }
  0xee   :  { %v219_v21 = vmax.f32 %v203_v52, %v211_v10  ;;  %v187_v23 = vpop.permute.xlu0 %186  ;;  %v200_v30 = vsel %vm120_vm0, %v723_v14, %v189_v22  ;;  %v142_v22 = vld [vmem:[#allocation6 + $0x28] sm:$0xff] }
  0xef   :  { %v199_v31 = vsel %vm120_vm0, %v723_v14, %v187_v23  ;;  %v273_v35 = vrot.slane %v220_v20, 7  ;;  %v314_v36 = vrot.slane %v220_v20, 1  ;;  %v216_v39 = vmax.f32 %v174_v27, %v200_v30 }
  0xf0   :  { %v271_v37 = vrot.slane %v219_v21, 7  ;;  %v312_v38 = vrot.slane %v219_v21, 1  ;;  %v215_v41 = vmax.f32 %v173_v28, %v199_v31  ;;  %vm381_vm1 = vcmp.ge.f32.partialorder %v142_v22, %v808_v13 }
  0xf1   :  { %v278_v14 = vsel %vm277_vm2, %v273_v35, %v275_v42  ;;  %v319_v52 = vsel %vm318_vm3, %v314_v36, %v316_v43  ;;  %v224_v40 = vmax.f32 %v208_v15, %v216_v39 }
  0xf2   :  { %v280_v49 = vsel %vm277_vm2, %v271_v37, %v273_v35  ;;  %v282_v51 = vsel %vm277_vm2, %v269_v44, %v271_v37  ;;  %v223_v50 = vmax.f32 %v207_v16, %v215_v41  ;;  %v321_v53 = vsel %vm318_vm3, %v312_v38, %v314_v36 }
  0xf3   :  { %v323_v42 = vsel %vm318_vm3, %v310_v45, %v312_v38  ;;  %v352_v59 = vmax.f32 %v282_v51, %v321_v53  ;;  %v353_v60 = vmax.f32 %v280_v49, %v319_v52  ;;  %v354_v44 = vmax.f32 %v278_v14, %v346_v19  ;;  %v141_v19 = vld [vmem:[#allocation6 + $0x20] sm:$0xff] }
  0xf4   :  { %v351_v54 = vmax.f32 %v302_v18, %v323_v42  ;;  %v274_v61 = vrot.slane %v224_v40, 7  ;;  %v315_v62 = vrot.slane %v224_v40, 1  ;;  %v272_v43 = vrot.slane %v223_v50, 7 }
  0xf5   :  { %v313_v63 = vrot.slane %v223_v50, 1  ;;  %v360_v9 = vmax.f32 %v219_v21, %v352_v59  ;;  %v361_v10 = vmax.f32 %v220_v20, %v353_v60  ;;  %v362_v15 = vmax.f32 %v755_v32, %v354_v44 }
  0xf6   :  { %v359_v8 = vmax.f32 %v757_v33, %v351_v54  ;;  %v279_v16 = vsel %vm277_vm2, %v274_v61, %v276_v55  ;;  %v281_v45 = vsel %vm277_vm2, %v272_v43, %v274_v61  ;;  %v283_v18 = vsel %vm277_vm2, %v270_v57, %v272_v43  ;;  %v143_v57 = vld [vmem:[#allocation6 + $0x30] sm:$0xff] }
  0xf7   :  { %v320_v33 = vsel %vm318_vm3, %v315_v62, %v317_v56  ;;  %v322_v32 = vsel %vm318_vm3, %v313_v63, %v315_v62  ;;  %v324_v55 = vsel %vm318_vm3, %v311_v58, %v313_v63  ;;  %v358_v21 = vmax.f32 %v279_v16, %v350_v11  ;;  %v144_v58 = vld [vmem:[#allocation6 + $0x38] sm:$0xff] }
  0xf8   :  { %v357_v20 = vmax.f32 %v281_v45, %v320_v33  ;;  %v355_v23 = vmax.f32 %v306_v48, %v324_v55  ;;  %v356_v25 = vmax.f32 %v283_v18, %v322_v32  ;;  %vm367_vm10 = vcmp.eq.f32.partialorder %v689_v1, %v359_v8 }
  0xf9   :  { %vm368_vm11 = vcmp.eq.f32.partialorder %v705_v5, %v360_v9  ;;  %v366_v26 = vmax.f32 %v771_v46, %v358_v21  ;;  %vm369_vm12 = vcmp.eq.f32.partialorder %v703_v4, %v361_v10  ;;  %vm370_vm13 = vcmp.eq.f32.partialorder %v695_v3, %v362_v15  ;;  %vm902_vm14 = vmand %vm367_vm10, %vm376_vm6 }
  0xfa   :  { %v365_v56 = vmax.f32 %v224_v40, %v357_v20  ;;  %v363_v1 = vmax.f32 %v773_v47, %v355_v23  ;;  %v364_v27 = vmax.f32 %v223_v50, %v356_v25  ;;  %vm380_vm15 = vcmp.ge.f32.partialorder %v141_v19, %v808_v13  ;;  %vm911_vm0 = vmand %vm368_vm11, %vm377_vm7 }
  0xfb   :  { %v967_v4 = vmov 0  ;;  %vm919_vm2 = vmand %vm369_vm12, %vm378_vm8  ;;  %v969_v3 = vmov 0  ;;  %vm382_vm6 = vcmp.ge.f32.partialorder %v143_v57, %v808_v13  ;;  %vm374_vm10 = vcmp.eq.f32.partialorder %v693_v2, %v366_v26 }
  0xfc   :  { %v968_v4 = vsel %vm911_vm0, 4294967295, %v967_v4  ;;  %v970_v3 = vsel %vm919_vm2, 4294967295, %v969_v3  ;;  %vm371_vm3 = vcmp.eq.f32.partialorder %v687_v0, %v363_v1  ;;  %vm372_vm4 = vcmp.eq.f32.partialorder %v711_v7, %v364_v27  ;;  %vm387_vm7 = vmand %vm370_vm13, %vm379_vm9 }
  0xfd   :  { %vm373_vm5 = vcmp.eq.f32.partialorder %v709_v6, %v365_v56  ;;  %vm383_vm11 = vcmp.ge.f32.partialorder %v144_v58, %v808_v13  ;;  %vm932_vm8 = vmand %vm371_vm3, %vm380_vm15  ;;  %v971_v5 = vmov 0  ;;  %vm973_vm9 = vnez %v968_v4 }
  0xfe   :  { %v972_v5 = vsel %vm932_vm8, 4294967295, %v971_v5  ;;  %vm389_vm12 = vmand %vm372_vm4, %vm381_vm1  ;;  %vm974_vm3 = vnez %v970_v3  ;;  %v583_v0 = vmov 0  }
  0xff   :  { %vm390_vm2 = vmand %vm373_vm5, %vm382_vm6  ;;  %vm975_vm1 = vnez %v972_v5 }
 0x100   :  { %vm391_vm0 = vmand %vm374_vm10, %vm383_vm11 }
 0x101   :  { %vm392_vm13 = vmpackc.low %vm973_vm9, %vm902_vm14 }
 0x102   :  { %vm393_vm15 = vmpackc.low %vm387_vm7, %vm974_vm3 }
 0x103   :  { %vm394_vm8 = vmpackc.even %vm393_vm15, %vm392_vm13 }
 0x104   :  { %vm395_vm4 = vmpackc.low %vm389_vm12, %vm975_vm1  ;;  %v398_v2 = vsel %vm394_vm8, 16843009, %v583_v0 }
 0x105   :  { %vm396_vm5 = vmpackc.low %vm391_vm0, %vm390_vm2  ;;  %400 = vst [vmem:[#allocation12] sm:$0xff] %v398_v2 }
 0x106   :  { %vm397_vm6 = vmpackc.even %vm396_vm5, %vm395_vm4 }
 0x107   :  { %v399_v6 = vsel %vm397_vm6, 16843009, %v583_v0 }
 0x108   :  { %401 = vst [vmem:[#allocation12 + $0x8] sm:$0xff] %v399_v6 }
 0x109   :  { %551 = shalt.err (!%p548_p3)
}
 0x10a   :  { %s552_s16 = scalar_lea.hbm %s964_s5, 256 }
 0x10b   :  { %p553_p4 = scmp.ne.s32.totalorder %s964_s5, %s552_s16  ;;  %p556_p5 = scmp.lt.u32.totalorder %s552_s16, %s964_s5 }
 0x10d   :  { %p558_p6 = pnand %p556_p5, %p553_p4 }
 0x10f   :  { %561 = shalt.err (!%p558_p6)
}
 0x110   :  { %413 = dma.vmem_to_hbm [thread:$0]  %s408_s12, 256, %s964_s5, [#allocation4], %s574_s30, %s574_s30, %s575_s6  }
 0x111   :  { %570 = dma.done.wait [#allocation4], 256  }
 0x112   :  { %571 = vsyncadd [#allocation4], 4294967040 }
 0x113   :  { %417 = vsyncpa [#allocation3], 1 }
 0x114   :  { %418 = vsyncpa [#allocation8], 1 }
 0x115   :  { %419 = vsyncpa [#allocation11], 1 }
 0x116   :  { %420 = vsyncpa [#allocation4], 1 }
 0x117   :  { %421 = vsyncpa [#allocation5], 1 }

</bundles_post_ra>
